<compile_context>
chip_gen: v7x
topology: tpu7x:2x2x1
jax: 0.10.0
libtpu: 0.0.40
codegen_flags: <defaults>
</compile_context>

<pallas_src>
import functools
import math

import jax
import jax.numpy as jnp
from jax.experimental import pallas as pl
from jax.experimental.pallas import tpu as pltpu

_TARGET_BLOCK_BYTES = 2 * 1024 * 1024  # ~2 MiB blocks: knee of the measured tile-size curve


def _pe_add_kernel(x_ref, o_ref, pe_ref, *, d_model: int, pos_per_row: int):
    """x_ref / o_ref: (tB, tR, Lw) blocks of the folded (B, R, Lw) input.
    pe_ref: (tR, Lw) VMEM scratch holding this row tile's positional encoding."""
    t_rows, lane = pe_ref.shape
    # Hoisted program_id reads (do NOT move these inside pl.when).
    r_idx = pl.program_id(0)  # row-tile index ("parallel", megacore-shardable)
    b_idx = pl.program_id(1)  # batch-tile index (innermost, "arbitrary")

    # PE depends only on the row tile: compute it once (first batch step of this
    # row tile) and reuse it for every batch block.
    @pl.when(b_idx == 0)
    def _():
        i = jax.lax.broadcasted_iota(jnp.int32, (t_rows, lane), 0).astype(jnp.float32)
        j = jax.lax.broadcasted_iota(jnp.int32, (t_rows, lane), 1).astype(jnp.float32)
        # Each folded row packs `pos_per_row` consecutive positions of width d_model:
        #   q = j // d_model, c = j % d_model
        # computed in f32 with a +0.5 guard (exact for these integer ranges); avoids
        # vector integer div/mod.
        q = jnp.floor((j + 0.5) * (1.0 / d_model))
        c = j - q * d_model
        parity = c - 2.0 * jnp.floor((c + 0.5) * 0.5)  # 0.0 -> even column, 1.0 -> odd
        row0 = (r_idx * t_rows).astype(jnp.float32)
        pos = (row0 + i) * float(pos_per_row) + q  # sequence position (exact int in f32)
        inv_freq = jnp.exp((c - parity) * (-math.log(10000.0) / d_model))
        arg = pos * inv_freq
        pe = jnp.where(parity > 0.5, jnp.cos(arg), jnp.sin(arg))
        pe_ref[...] = pe.astype(pe_ref.dtype)

    # Steady state: pure elementwise add, broadcast over the batch block.
    pe = pe_ref[...][None, :, :].astype(x_ref.dtype)
    o_ref[...] = (x_ref[...] + pe).astype(o_ref.dtype)


def _choose_lane_width(seq_len: int, d_model: int) -> int:
    """Fold (S, D) -> (R, Lw) with Lw = k*D, k | S.  Prefer the smallest k making
    Lw a multiple of 128 (dense, unmasked stores); else the smallest k with
    Lw >= 128; else Lw = D."""
    divisors = [k for k in range(1, seq_len + 1) if seq_len % k == 0]
    dense = [k * d_model for k in divisors
             if (k * d_model) % 128 == 0 and k * d_model <= 8192]
    if dense:
        return min(dense)
    wide = [k * d_model for k in divisors if 128 <= k * d_model <= 2048]
    if wide:
        return min(wide)
    return d_model


def _choose_tiles(batch: int, rows: int, lane: int, x_itemsize: int) -> tuple[int, int]:
    """Byte-aware (batch_tile, row_tile): ~2 MiB blocks, row tile a multiple of 8
    (or the full dim), and >= 2 row tiles when possible (v7x megacore)."""
    row_bytes = lane * x_itemsize
    if rows <= 8:
        t_rows = rows
    else:
        want = max(8, (_TARGET_BLOCK_BYTES // row_bytes) // 8 * 8)
        megacore_cap = max(8, (rows // 2) // 8 * 8)  # leave >= 2 row tiles
        t_rows = min(want, megacore_cap)
    block_bytes = max(1, t_rows * row_bytes)
    t_batch = int(max(1, min(batch, _TARGET_BLOCK_BYTES // block_bytes)))
    return t_batch, t_rows


def positional_encoding(x: jax.Array, max_len: int = 5000) -> jax.Array:
    """Adds sinusoidal positional encoding to x of shape (B, S, D)."""
    batch, seq_len, d_model = x.shape
    if seq_len > max_len:
        raise ValueError(f"sequence length {seq_len} exceeds max_len {max_len}")

    lane = _choose_lane_width(seq_len, d_model)
    pos_per_row = lane // d_model
    rows = seq_len // pos_per_row  # rows * lane == S * D
    x_folded = x.reshape(batch, rows, lane)

    x_itemsize = jnp.dtype(x.dtype).itemsize
    pe_dtype = x.dtype if jnp.issubdtype(x.dtype, jnp.floating) else jnp.float32
    pe_itemsize = jnp.dtype(pe_dtype).itemsize
    t_batch, t_rows = _choose_tiles(batch, rows, lane, x_itemsize)

    grid = (pl.cdiv(rows, t_rows), pl.cdiv(batch, t_batch))
    block = (t_batch, t_rows, lane)

    # 2 in + 2 out double-buffers + single-buffered PE scratch.
    footprint = 4 * t_batch * t_rows * lane * x_itemsize + t_rows * lane * pe_itemsize
    vmem_limit = int(min(max(2 * footprint, 32 * 1024 * 1024), 56 * 1024 * 1024))

    kernel = functools.partial(
        _pe_add_kernel, d_model=d_model, pos_per_row=pos_per_row
    )

    out_folded = pl.pallas_call(
        kernel,
        out_shape=jax.ShapeDtypeStruct((batch, rows, lane), x.dtype),
        grid=grid,
        in_specs=[pl.BlockSpec(block, lambda r, b: (b, r, 0))],
        out_specs=pl.BlockSpec(block, lambda r, b: (b, r, 0)),
        scratch_shapes=[pltpu.VMEM((t_rows, lane), pe_dtype)],
        input_output_aliases={0: 0},  # same shape/dtype: reuse x's HBM buffer
        compiler_params=pltpu.CompilerParams(
            # Row tiles parallel (megacore); batch MUST stay innermost/sequential
            # so b == 0 (the PE-scratch init step) runs first for every row tile.
            dimension_semantics=("parallel", "arbitrary"),
            vmem_limit_bytes=vmem_limit,
        ),
    )(x_folded)
    return out_folded.reshape(batch, seq_len, d_model)


def _reference_pe(seq_len: int, d_model: int) -> jnp.ndarray:
    """Plain-JAX re-implementation of the PyTorch pe buffer (for checking)."""
    position = jnp.arange(seq_len, dtype=jnp.float32)[:, None]
    div_term = jnp.exp(
        jnp.arange(0, d_model, 2, dtype=jnp.float32) * (-math.log(10000.0) / d_model)
    )
    pe = jnp.zeros((seq_len, d_model), dtype=jnp.float32)
    pe = pe.at[:, 0::2].set(jnp.sin(position * div_term))
    pe = pe.at[:, 1::2].set(jnp.cos(position * div_term))
    return pe


if __name__ == "__main__":
    B, S, D = 2, 8, 32  # batch, seq, d_model (small test shapes)
    key = jax.random.PRNGKey(0)
    x = jax.random.normal(key, (B, S, D), dtype=jnp.float32)

    # Eval-mode reference (dropout == identity), computed before the kernel call.
    ref = x + _reference_pe(S, D)[None, :, :]

    out = jax.block_until_ready(positional_encoding(x))

    assert out.shape == (B, S, D)
    assert out.dtype == x.dtype
    assert jnp.allclose(out, ref, atol=2e-5, rtol=1e-5), "mismatch vs reference"

    print("KERNEL_OK")
</pallas_src>

<mosaic_0001>
module attributes {stable_mosaic.version = 11 : i64} {
  func.func @_pe_add_kernel(%arg0: i32, %arg1: i32, %arg2: memref<2x2x128xf32, #tpu.memory_space<vmem>>, %arg3: memref<2x2x128xf32, #tpu.memory_space<vmem>>, %arg4: memref<2x128xf32, #tpu.memory_space<vmem>>) attributes {dimension_semantics = [#tpu.dimension_semantics<parallel>, #tpu.dimension_semantics<arbitrary>], iteration_bounds = array<i64: 1, 1>, scalar_prefetch = 0 : i64, scratch_operands = 1 : i64, tpu.core_type = #tpu.core_type<tc>, window_params = [{transform_indices = @transform_0, window_bounds = array<i64: 2, 2, 128>}, {transform_indices = @transform_1, window_bounds = array<i64: 2, 2, 128>}]} {
    %c0_i32 = arith.constant 0 : i32
    %0 = arith.cmpi eq, %arg1, %c0_i32 : i32
    %1 = arith.extui %0 : i1 to i32
    %c0_i32_0 = arith.constant 0 : i32
    %2 = arith.cmpi ne, %1, %c0_i32_0 : i32
    scf.if %2 {
      %9 = tpu.iota {dimensions = array<i32: 0>} : vector<2x128xi32>
      %10 = arith.sitofp %9 : vector<2x128xi32> to vector<2x128xf32>
      %11 = tpu.iota {dimensions = array<i32: 1>} : vector<2x128xi32>
      %12 = arith.sitofp %11 : vector<2x128xi32> to vector<2x128xf32>
      %cst = arith.constant 5.000000e-01 : f32
      %13 = vector.broadcast %cst : f32 to vector<2x128xf32>
      %14 = arith.addf %12, %13 : vector<2x128xf32>
      %cst_8 = arith.constant 3.125000e-02 : f32
      %15 = vector.broadcast %cst_8 : f32 to vector<2x128xf32>
      %16 = arith.mulf %14, %15 : vector<2x128xf32>
      %17 = math.floor %16 : vector<2x128xf32>
      %cst_9 = arith.constant 3.200000e+01 : f32
      %18 = vector.broadcast %cst_9 : f32 to vector<2x128xf32>
      %19 = arith.mulf %17, %18 : vector<2x128xf32>
      %20 = arith.subf %12, %19 : vector<2x128xf32>
      %cst_10 = arith.constant 5.000000e-01 : f32
      %21 = vector.broadcast %cst_10 : f32 to vector<2x128xf32>
      %22 = arith.addf %20, %21 : vector<2x128xf32>
      %cst_11 = arith.constant 5.000000e-01 : f32
      %23 = vector.broadcast %cst_11 : f32 to vector<2x128xf32>
      %24 = arith.mulf %22, %23 : vector<2x128xf32>
      %25 = math.floor %24 : vector<2x128xf32>
      %cst_12 = arith.constant 2.000000e+00 : f32
      %26 = vector.broadcast %cst_12 : f32 to vector<2x128xf32>
      %27 = arith.mulf %26, %25 : vector<2x128xf32>
      %28 = arith.subf %20, %27 : vector<2x128xf32>
      %c2_i32 = arith.constant 2 : i32
      %29 = arith.muli %arg0, %c2_i32 : i32
      %30 = arith.sitofp %29 : i32 to f32
      %31 = vector.broadcast %30 : f32 to vector<2x128xf32>
      %32 = arith.addf %31, %10 : vector<2x128xf32>
      %cst_13 = arith.constant 4.000000e+00 : f32
      %33 = vector.broadcast %cst_13 : f32 to vector<2x128xf32>
      %34 = arith.mulf %32, %33 : vector<2x128xf32>
      %35 = arith.addf %34, %17 : vector<2x128xf32>
      %36 = arith.subf %20, %28 : vector<2x128xf32>
      %cst_14 = arith.constant -0.287823141 : f32
      %37 = vector.broadcast %cst_14 : f32 to vector<2x128xf32>
      %38 = arith.mulf %36, %37 : vector<2x128xf32>
      %39 = math.exp %38 : vector<2x128xf32>
      %40 = arith.mulf %35, %39 : vector<2x128xf32>
      %cst_15 = arith.constant 5.000000e-01 : f32
      %41 = vector.broadcast %cst_15 : f32 to vector<2x128xf32>
      %42 = arith.cmpf ogt, %28, %41 : vector<2x128xf32>
      %43 = math.cos %40 : vector<2x128xf32>
      %44 = math.sin %40 : vector<2x128xf32>
      %45 = arith.select %42, %43, %44 : vector<2x128xi1>, vector<2x128xf32>
      %c0_16 = arith.constant 0 : index
      %c0_17 = arith.constant 0 : index
      %46 = vector.load %arg4[%c0_16, %c0_17] : memref<2x128xf32, #tpu.memory_space<vmem>>, vector<2x128xf32>
      tpu.vector_store %arg4[%c0_16, %c0_17], %45 {strides = array<i32>} : memref<2x128xf32, #tpu.memory_space<vmem>>, vector<2x128xf32>,
    } else {
    }
    %c0 = arith.constant 0 : index
    %c0_1 = arith.constant 0 : index
    %3 = vector.load %arg4[%c0, %c0_1] : memref<2x128xf32, #tpu.memory_space<vmem>>, vector<2x128xf32>
    %4 = vector.shape_cast %3 : vector<2x128xf32> to vector<1x2x128xf32>
    %c0_2 = arith.constant 0 : index
    %c0_3 = arith.constant 0 : index
    %c0_4 = arith.constant 0 : index
    %5 = vector.load %arg2[%c0_2, %c0_3, %c0_4] : memref<2x2x128xf32, #tpu.memory_space<vmem>>, vector<2x2x128xf32>
    %6 = vector.broadcast %4 : vector<1x2x128xf32> to vector<2x2x128xf32>
    %7 = arith.addf %5, %6 : vector<2x2x128xf32>
    %c0_5 = arith.constant 0 : index
    %c0_6 = arith.constant 0 : index
    %c0_7 = arith.constant 0 : index
    %8 = vector.load %arg3[%c0_5, %c0_6, %c0_7] : memref<2x2x128xf32, #tpu.memory_space<vmem>>, vector<2x2x128xf32>
    tpu.vector_store %arg3[%c0_5, %c0_6, %c0_7], %7 {strides = array<i32>} : memref<2x2x128xf32, #tpu.memory_space<vmem>>, vector<2x2x128xf32>,
    return
  }
  func.func @transform_0(%arg0: i32, %arg1: i32) -> (i32, i32, i32) {
    %c0_i32 = arith.constant 0 : i32
    %c0_i32_0 = arith.constant 0 : i32
    return %arg1, %arg0, %c0_i32 : i32, i32, i32
  }
  func.func @transform_1(%arg0: i32, %arg1: i32) -> (i32, i32, i32) {
    %c0_i32 = arith.constant 0 : i32
    %c0_i32_0 = arith.constant 0 : i32
    return %arg1, %arg0, %c0_i32 : i32, i32, i32
  }
}

</mosaic_0001>

<bundles_post_ra>
// kernel: tpu_custom_call.1
= control target key start
LH: loop header
LB: loop body
LE: loop exit
PB: predicated region body
PF: predicated region fallthrough
CT: control target
= control target key end

     0   :  { %6 = vsyncpa [#allocation4], 0  ;;  %s439_s0 = inlined_call_operand.hbm [shape: f32[2,2,128], index: 0, kind: input, shape index: {}, may-alias: {0,1}]   ;;  %s440_s1 = inlined_call_operand.hbm [shape: f32[2,2,128], index: 1, kind: output, shape index: {}, may-alias: {0,1}]  }
   0x1   :  { %7 = vsyncpa [#allocation5], 0  ;;  %s364_s6 = smov [#allocation3]   ;;  %s316_s10 = scalar_lea.hbm %s439_s0, 64 }
   0x2   :  { %s13_s7 = sshll.u32 %s364_s6, 4  ;;  %p317_p0 = scmp.ne.s32.totalorder %s439_s0, %s316_s10  ;;  %s14_s7 = int_to_ptr.vmem [resolvable:$true] %s13_s7 }
   0x3   :  { %p320_p1 = scmp.lt.u32.totalorder %s316_s10, %s439_s0 }
   0x5   :  { %p322_p2 = pnand %p320_p1, %p317_p0 }
   0x7   :  { %325 = shalt.err (!%p322_p2)
}
   0x8   :  { %s326_s15 = scalar_lea.vmem %s14_s7, 64  ;;  %p331_p4 = scmp.lt.s32.totalorder %s14_s7, %s14_s7 }
   0x9   :  { %p327_p3 = scmp.ne.s32.totalorder %s14_s7, %s326_s15  ;;  %p332_p5 = scmp.lt.s32.totalorder %s326_s15, %s326_s15 }
   0xb   :  { %p333_p6 = por %p332_p5, %p331_p4 }
   0xd   :  { %p334_p7 = pnand %p333_p6, %p327_p3 }
   0xf   :  { %337 = shalt.err (!%p334_p7)
}
  0x10   :  { %s365_s16 = smov 32   ;;  %s366_s17 = smov 2  }
  0x11   :  { %19 = dma.hbm_to_vmem [thread:$0]  %s439_s0, 64, %s14_s7, [#allocation4], %s365_s16, %s365_s16, %s366_s17  }
  0x12   :  { %360 = dma.done.wait [#allocation4], 64  }
  0x13   :  { %361 = vsyncadd [#allocation4], 4294967232  ;;  %v27_v0 = vlaneseq  ;;  %v367_v33 = vmov 683565275   ;;  %v368_v35 = vmov 2475754826  }
  0x14   :  { %v369_v37 = vmov 2131351028   ;;  %v370_v39 = vmov 2102212464   ;;  %v371_v41 = vmov 920167782  }
  0x15   :  { %v31_v1 = vand.u32 127, %v27_v0  ;;  %v28_v14 = vshrl.u32 %v27_v0, 7  ;;  %v372_v48 = vmov 1326507024   ;;  %s373_s0 = smov [#allocation6]  }
  0x16   :  { %s276_s20 = sshll.u32 %s373_s0, 4  ;;  %s277_s20 = int_to_ptr.vmem [resolvable:$true] %s276_s20 }
  0x17   :  { %v32_v2 = vcvt.s32.f32 %v31_v1  ;;  %v29_v17 = vcvt.s32.f32 %v28_v14  ;;  %s338_s21 = scalar_lea.vmem %s277_s20, 64  ;;  %p343_p9 = scmp.lt.s32.totalorder %s277_s20, %s277_s20 }
  0x18   :  { %p339_p8 = scmp.ne.s32.totalorder %s277_s20, %s338_s21  ;;  %p344_p10 = scmp.lt.s32.totalorder %s338_s21, %s338_s21 }
  0x19   :  { %v33_v3 = vadd.f32 0.5, %v32_v2  ;;  %v47_v18 = vmul.f32 4.0, %v29_v17 }
  0x1a   :  { %p345_p11 = por %p344_p10, %p343_p9 }
  0x1b   :  { %v34_v4 = vmul.f32 0.03125, %v33_v3 }
  0x1c   :  { %p346_p12 = pnand %p345_p11, %p339_p8 }
  0x1d   :  { %v35_v5 = vfloor.f32 %v34_v4 }
  0x1f   :  { %v36_v6 = vmul.f32 32.0, %v35_v5  ;;  %v48_v19 = vadd.f32 %v47_v18, %v35_v5 }
  0x21   :  { %v37_v7 = vsub.f32 %v32_v2, %v36_v6 }
  0x23   :  { %v38_v8 = vadd.f32 0.5, %v37_v7 }
  0x25   :  { %v39_v9 = vmul.f32 0.5, %v38_v8 }
  0x27   :  { %v40_v10 = vfloor.f32 %v39_v9 }
  0x29   :  { %v41_v11 = vmul.f32 2.0, %v40_v10 }
  0x2b   :  { %v399_v12 = vsub.f32 %v37_v7, %v41_v11 }
  0x2d   :  { %v49_v13 = vsub.f32 %v37_v7, %v399_v12 }
  0x2f   :  { %v50_v15 = vmul.f32 -0.28782314, %v49_v13 }
  0x31   :  { %v51_v16 = vmul.f32 1.442695, %v50_v15 }
  0x33   :  { %310 = vpow2.f32 %v51_v16 }
  0x3d   :  { %v311_v20 = vpop.eup %310 }
  0x3e   :  { %v402_v21 = vmul.f32 %v311_v20, %v48_v19 }
  0x40   :  { %v58_v22 = vand.u32 2139095040, %v402_v21  ;;  %v55_v24 = vand.u32 2147483647, %v402_v21  ;;  %vm57_vm7 = vcmp.lt.s32.totalorder %v402_v21, 0  ;;  %vm147_vm15 = vweird.f32 %v402_v21 }
  0x42   :  { %v59_v23 = vshrl.u32 %v58_v22, 23  ;;  %v62_v27 = vand.u32 8388607, %v55_v24  ;;  %vm56_vm8 = vcmp.le.f32.partialorder %v55_v24, 0.7853982 }
  0x44   :  { %v288_v25 = vadd.s32 4294967169, %v59_v23  ;;  %v63_v30 = vor.u32 8388608, %v62_v27 }
  0x46   :  { %v65_v26 = vadd.s32 1, %v288_v25  ;;  %v103_v50 = vshll.u32 %v63_v30, 8 }
  0x48   :  { %vm66_vm0 = vcmp.gt.s32.totalorder %v65_v26, 0 }
  0x49   :  { %v67_v28 = vsel %vm66_vm0, %v65_v26, 0  ;;  %vm54_vm0 = vcmp.gt.f32.partialorder %v399_v12, 0.5 }
  0x4a   :  { %v69_v29 = vand.u32 31, %v67_v28  ;;  %v68_v31 = vshrl.u32 %v67_v28, 5 }
  0x4c   :  { %v70_v32 = vsub.s32 32, %v69_v29  ;;  %v72_v34 = vshll.u32 %v367_v33, %v69_v29  ;;  %v75_v36 = vshll.u32 %v368_v35, %v69_v29  ;;  %v78_v38 = vshll.u32 %v369_v37, %v69_v29 }
  0x4d   :  { %v81_v40 = vshll.u32 %v370_v39, %v69_v29  ;;  %v84_v42 = vshll.u32 %v371_v41, %v69_v29  ;;  %vm87_vm1 = vcmp.lt.s32.totalorder %v68_v31, 1  ;;  %vm90_vm2 = vcmp.lt.s32.totalorder %v68_v31, 4 }
  0x4e   :  { %v71_v43 = vshrl.u32 %v367_v33, %v70_v32  ;;  %v73_v44 = vshrl.u32 %v368_v35, %v70_v32  ;;  %v76_v45 = vshrl.u32 %v369_v37, %v70_v32  ;;  %v79_v46 = vshrl.u32 %v370_v39, %v70_v32 }
  0x4f   :  { %v82_v47 = vshrl.u32 %v371_v41, %v70_v32  ;;  %v85_v49 = vshrl.u32 %v372_v48, %v70_v32  ;;  %vm88_vm3 = vcmp.lt.s32.totalorder %v68_v31, 2  ;;  %vm89_vm4 = vcmp.lt.s32.totalorder %v68_v31, 3 }
  0x50   :  { %v74_v51 = vor.u32 %v73_v44, %v72_v34  ;;  %v77_v52 = vor.u32 %v76_v45, %v75_v36  ;;  %v80_v53 = vor.u32 %v79_v46, %v78_v38 }
  0x51   :  { %v83_v54 = vor.u32 %v82_v47, %v81_v40  ;;  %v86_v55 = vor.u32 %v85_v49, %v84_v42 }
  0x52   :  { %v91_v56 = vsel %vm87_vm1, %v71_v43, %v74_v51  ;;  %v92_v57 = vsel %vm90_vm2, %v80_v53, 2102212464  ;;  %v95_v58 = vsel %vm87_vm1, %v74_v51, %v77_v52  ;;  %v99_v59 = vsel %vm87_vm1, %v77_v52, %v80_v53 }
  0x53   :  { %v93_v60 = vsel %vm89_vm4, %v77_v52, %v92_v57  ;;  %v96_v61 = vsel %vm90_vm2, %v83_v54, 920167782  ;;  %v100_v62 = vsel %vm90_vm2, %v86_v55, 1326507024  ;;  %v265_v57 = vld [vmem:[#allocation3] sm:$0x3] }
  0x54   :  { %v97_v63 = vsel %vm89_vm4, %v80_v53, %v96_v61  ;;  %v101_v0 = vsel %vm89_vm4, %v83_v54, %v100_v62  ;;  %v94_v1 = vsel %vm88_vm3, %v91_v56, %v93_v60 }
  0x55   :  { %v98_v2 = vsel %vm88_vm3, %v95_v58, %v97_v63  ;;  %v102_v3 = vsel %vm88_vm3, %v99_v59, %v101_v0  ;;  %v110_v8 = vmul.u32 %v103_v50, %v94_v1  ;;  %v266_v58 = vld [vmem:[#allocation3 + $0x2] sm:$0x3] }
  0x56   :  { %v408_v4 = vmul.u32.u64.low %v103_v50, %v102_v3  ;;  %v409_v5 = vmul.u32.u64.high %v103_v50, %v102_v3, %v408_v4  ;;  %v411_v6 = vmul.u32.u64.low %v103_v50, %v98_v2  ;;  %v412_v7 = vmul.u32.u64.high %v103_v50, %v98_v2, %v411_v6 }
  0x58   :  { %vm112_vm5 = vc.u32 %v409_v5, %v411_v6  ;;  %v113_v9 = vadd.s32 1, %v412_v7  ;;  %v111_v22 = vadd.s32 %v411_v6, %v409_v5 }
  0x5a   :  { %v114_v10 = vsel %vm112_vm5, %v113_v9, %v412_v7 }
  0x5b   :  { %v115_v11 = vadd.s32 %v114_v10, %v110_v8 }
  0x5d   :  { %v116_v13 = vadd.s32 536870912, %v115_v11 }
  0x5f   :  { %v117_v14 = vshrl.u32 %v116_v13, 30 }
  0x61   :  { %v118_v15 = vshll.u32 %v117_v14, 30  ;;  %v141_v35 = vsub.s32 4, %v117_v14 }
  0x63   :  { %v119_v16 = vsub.s32 %v115_v11, %v118_v15  ;;  %v142_v38 = vsel %vm57_vm7, %v141_v35, %v117_v14 }
  0x64   :  { %v144_v41 = vsel %vm56_vm8, 0, %v142_v38 }
  0x65   :  { %v121_v17 = vsub.s32 0, %v119_v16  ;;  %v251_v42 = vadd.s32 3, %v144_v41  ;;  %v148_v43 = vand.u32 3, %v144_v41 }
  0x67   :  { %v289_v18 = vmin.u32 %v121_v17, %v119_v16  ;;  %v252_v44 = vand.u32 3, %v251_v42  ;;  %vm153_vm9 = vcmp.eq.s32.totalorder %v148_v43, 2  ;;  %vm150_vm11 = vcmp.eq.s32.totalorder %v148_v43, 0 }
  0x68   :  { %vm149_vm13 = vcmp.lt.s32.totalorder %v148_v43, 2 }
  0x69   :  { %v123_v19 = vclz %v289_v18  ;;  %vm257_vm10 = vcmp.eq.s32.totalorder %v252_v44, 2  ;;  %vm254_vm12 = vcmp.eq.s32.totalorder %v252_v44, 0  ;;  %vm253_vm14 = vcmp.lt.s32.totalorder %v252_v44, 2 }
  0x6b   :  { %v290_v20 = vadd.s32 4294967294, %v123_v19 }
  0x6d   :  { %vm291_vm6 = vcmp.lt.s32.totalorder %v290_v20, 0 }
  0x6e   :  { %v126_v23 = vsel %vm291_vm6, 0, %v290_v20 }
  0x6f   :  { %v127_v25 = vsub.s32 32, %v126_v23  ;;  %v128_v26 = vshll.u32 %v119_v16, %v126_v23  ;;  %v131_v27 = vsub.s32 4294967266, %v126_v23 }
  0x71   :  { %v129_v28 = vshrl.u32 %v111_v22, %v127_v25  ;;  %v132_v29 = vadd.s32 127, %v131_v27 }
  0x73   :  { %v130_v30 = vor.u32 %v129_v28, %v128_v26  ;;  %v133_v31 = vshll.u32 %v132_v29, 23 }
  0x75   :  { %v134_v32 = vor.u32 4788187, %v133_v31  ;;  %v137_v33 = vcvt.s32.f32 %v130_v30 }
  0x77   :  { %v135_v34 = vand.u32 2147483647, %v134_v32 }
  0x79   :  { %v138_v36 = vmul.f32 %v137_v33, %v135_v34 }
  0x7b   :  { %v139_v37 = vxor.u32 2147483648, %v138_v36 }
  0x7d   :  { %v140_v39 = vsel %vm57_vm7, %v139_v37, %v138_v36 }
  0x7e   :  { %v143_v40 = vsel %vm56_vm8, %v402_v21, %v140_v39 }
  0x7f   :  { %312 = vcosq.f32 %v143_v40 }
  0x80   :  { %314 = vsinq.f32 %v143_v40 }
  0x89   :  { %v313_v45 = vpop.eup %312 }
  0x8a   :  { %v315_v46 = vpop.eup %314  ;;  %v154_v47 = vxor.u32 2147483648, %v313_v45 }
  0x8b   :  { %v151_v24 = vxor.u32 2147483648, %v315_v46 }
  0x8c   :  { %v155_v48 = vsel %vm153_vm9, %v154_v47, %v315_v46  ;;  %v259_v49 = vsel %vm257_vm10, %v154_v47, %v315_v46 }
  0x8d   :  { %v152_v50 = vsel %vm150_vm11, %v313_v45, %v151_v24  ;;  %v256_v51 = vsel %vm254_vm12, %v313_v45, %v151_v24 }
  0x8e   :  { %v156_v52 = vsel %vm149_vm13, %v152_v50, %v155_v48  ;;  %v260_v53 = vsel %vm253_vm14, %v256_v51, %v259_v49 }
  0x8f   :  { %v157_v54 = vsel %vm147_vm15, nan, %v156_v52  ;;  %v261_v55 = vsel %vm147_vm15, nan, %v260_v53 }
  0x90   :  { %v262_v56 = vsel %vm54_vm0, %v157_v54, %v261_v55 }
  0x91   :  { %263 = vst [vmem:[#allocation2] sm:$0x3] %v262_v56 }
  0x98   :  { %v264_v59 = vld [vmem:[#allocation2] sm:$0x3] }
  0x99   :  { %v267_v60 = vadd.f32 %v265_v57, %v264_v59  ;;  %v268_v61 = vadd.f32 %v266_v58, %v264_v59 }
  0x9b   :  { %269 = vst [vmem:[#allocation6] sm:$0x3] %v267_v60  ;;  %270 = vst [vmem:[#allocation6 + $0x2] sm:$0x3] %v268_v61 }
  0x9c   :  { %349 = shalt.err (!%p346_p12)
}
  0x9d   :  { %s350_s24 = scalar_lea.hbm %s440_s1, 64 }
  0x9e   :  { %p351_p13 = scmp.ne.s32.totalorder %s440_s1, %s350_s24  ;;  %p354_p0 = scmp.lt.u32.totalorder %s350_s24, %s440_s1 }
  0xa0   :  { %p356_p1 = pnand %p354_p0, %p351_p13 }
  0xa2   :  { %359 = shalt.err (!%p356_p1)
}
  0xa3   :  { %282 = dma.vmem_to_hbm [thread:$0]  %s277_s20, 64, %s440_s1, [#allocation5], %s365_s16, %s365_s16, %s366_s17  }
  0xa4   :  { %362 = dma.done.wait [#allocation5], 64  }
  0xa5   :  { %363 = vsyncadd [#allocation5], 4294967232 }
  0xa6   :  { %286 = vsyncpa [#allocation4], 1 }
  0xa7   :  { %287 = vsyncpa [#allocation5], 1 }

</bundles_post_ra>
